<compile_context>
chip_gen: v7x
topology: tpu7x:2x2x1
jax: 0.10.0
libtpu: 0.0.40
codegen_flags: <defaults>
</compile_context>

<pallas_src>
import jax
import jax.numpy as jnp
import numpy as np
from jax.experimental import pallas as pl
from jax.experimental.pallas import tpu as pltpu

INPUT_DIM = 16
HIDDEN_DIM = 32
NUM_CLASSES = 8
NUM_LAYERS = 2
BATCH = 4
LN_EPS = 1e-5
LANE = 128                       # lane width; 4 * HIDDEN_DIM == LANE

# Packed-parameter row layout (all starts 8-aligned, 128 lanes wide).
ROW_EMB = 0                                   # INPUT_DIM rows: fused embed+layer0 slab
ROW_VEC = ROW_EMB + INPUT_DIM                 # 8 rows: 0=bias0 1=gamma 2=beta 3=bc 4=mask
ROW_WL = ROW_VEC + 8                          # (NUM_LAYERS-1) slabs of LANE rows each
ROW_WC = ROW_WL + (NUM_LAYERS - 1) * LANE     # classifier slab, LANE rows
TOTAL_ROWS = ROW_WC + LANE                    # 280


def simple_rwkv_kernel(x_ref, p_ref, out_ref):
    """Fused embed -> NUM_LAYERS x (folded RWKV block + residual + LN) -> classifier."""
    x = x_ref[...]                                          # (B, INPUT_DIM)
    b = x.shape[0]

    emb = p_ref[ROW_EMB:ROW_EMB + INPUT_DIM, :]             # (I, 128) fused slab
    bias0 = p_ref[ROW_VEC + 0:ROW_VEC + 1, :]               # (1, 128)
    gamma = p_ref[ROW_VEC + 1:ROW_VEC + 2, :]
    beta = p_ref[ROW_VEC + 2:ROW_VEC + 3, :]
    bc = p_ref[ROW_VEC + 3:ROW_VEC + 4, :]
    mask = p_ref[ROW_VEC + 4:ROW_VEC + 5, :]                # 1.0 on lanes 0..H-1

    # Hoist broadcasts out of the statically-unrolled layer loop.
    gamma_b = jnp.broadcast_to(gamma, (b, LANE))
    beta_b = jnp.broadcast_to(beta, (b, LANE))
    mask_b = jnp.broadcast_to(mask, (b, LANE))
    inv_h = 1.0 / HIDDEN_DIM

    def layer_norm(pre):
        # pre has an exactly-zero tail, so full-lane sums == sums over H lanes.
        s1 = jnp.sum(pre, axis=-1, keepdims=True)
        s2 = jnp.sum(pre * pre, axis=-1, keepdims=True)
        mean = s1 * inv_h
        var = s2 * inv_h - mean * mean
        # Zero-padded gamma/beta restore the zero tail after the affine.
        return (pre - mean) * jax.lax.rsqrt(var + LN_EPS) * gamma_b + beta_b

    # --- embedding fused with layer-0 projections: one (B,I)@(I,128) dot ----
    # f0 lanes: [0:H)=u0=h0@Wvo0, [H:2H)=h0, [2H:3H)=rpre0=h0@Wr0', [3H:4H)=h0
    f0 = jnp.dot(x, emb, preferred_element_type=jnp.float32) + bias0
    g0 = jax.nn.sigmoid(f0)                                 # full-vreg EUP
    sig_r = pltpu.roll(g0, shift=64, axis=1)                # lanes 0..H-1 <- sigmoid(rpre0)
    h_res = pltpu.roll(f0, shift=32, axis=1)                # lanes 0..H-1 <- h0 (duplicated)
    pre = (h_res + sig_r * f0) * mask_b                     # h0 + sigmoid(rpre0)*u0, zero tail
    h = layer_norm(pre)

    # --- remaining layers: one (B,128)@(128,128) dot each --------------------
    for l in range(1, NUM_LAYERS):                          # static unroll
        r0 = ROW_WL + (l - 1) * LANE
        wl = p_ref[r0:r0 + LANE, :]                         # [Wvo_l | 0 | Wr'_l | 0], zero K-pad
        f = jnp.dot(h, wl, preferred_element_type=jnp.float32)   # [u | 0 | rpre | 0]
        g = jax.nn.sigmoid(f)
        sig_r = pltpu.roll(g, shift=64, axis=1)             # lanes 0..H-1 <- sigmoid(rpre)
        pre = (h + sig_r * f) * mask_b                      # h + sigmoid(rpre)*u, zero tail
        h = layer_norm(pre)
        # dropout: identity (eval mode)

    # --- lane-dense classifier: (128,128) zero-padded slab, full-tile store --
    wc = p_ref[ROW_WC:ROW_WC + LANE, :]
    out_ref[...] = jnp.dot(h, wc, preferred_element_type=jnp.float32) + bc


@jax.jit
def simple_rwkv_forward(x, packed):
    """Single launch, everything VMEM-resident (tiny shapes); no batch pad."""
    vmem = pl.BlockSpec(memory_space=pltpu.MemorySpace.VMEM)
    out = pl.pallas_call(
        simple_rwkv_kernel,
        out_shape=jax.ShapeDtypeStruct((x.shape[0], LANE), jnp.float32),
        in_specs=[vmem, vmem],
        out_specs=vmem,
    )(x, packed)
    return out[:, :NUM_CLASSES]


def init_params(key):
    """Deterministic synthetic parameters in torch convention (out, in).

    Parameters that provably never influence this forward pass (key weights,
    time_decay, time_mix_k) are intentionally not materialized.
    """
    ks = jax.random.split(key, 9)
    return {
        "we": jax.random.normal(ks[0], (HIDDEN_DIM, INPUT_DIM), jnp.float32) * 0.1,
        "be": jax.random.normal(ks[1], (HIDDEN_DIM,), jnp.float32) * 0.1,
        "wc": jax.random.normal(ks[2], (NUM_CLASSES, HIDDEN_DIM), jnp.float32) * 0.1,
        "bc": jax.random.normal(ks[3], (NUM_CLASSES,), jnp.float32) * 0.1,
        "gamma": 1.0 + 0.1 * jax.random.normal(ks[4], (HIDDEN_DIM,), jnp.float32),
        "beta": 0.1 * jax.random.normal(ks[5], (HIDDEN_DIM,), jnp.float32),
        "time_mix_v": jnp.full((NUM_LAYERS, HIDDEN_DIM), 0.5, jnp.float32),
        "time_mix_r": jnp.full((NUM_LAYERS, HIDDEN_DIM), 0.5, jnp.float32),
        "wv": jax.random.normal(ks[6], (NUM_LAYERS, HIDDEN_DIM, HIDDEN_DIM), jnp.float32) * 0.1,
        "wr": jax.random.normal(ks[7], (NUM_LAYERS, HIDDEN_DIM, HIDDEN_DIM), jnp.float32) * 0.1,
        "wo": jax.random.normal(ks[8], (NUM_LAYERS, HIDDEN_DIM, HIDDEN_DIM), jnp.float32) * 0.1,
    }


def pack_kernel_params(p):
    """Pack everything into one lane-dense (TOTAL_ROWS, 128) f32 buffer.

    Offline folds (done in float64):
      Wvo_l = diag(mv_l) @ Wv_l^T @ Wo_l^T          (value+output fold)
      Wr'_l = diag(mr_l) @ Wr_l^T                    (receptance mix fold)
      Embedding slab columns: [We^T@Wvo0 | We^T | We^T@Wr0' | We^T] so one
      x-dot yields layer-0's u0, rpre0 and h0 (h0 duplicated at +-32 lanes so
      the in-kernel 32-lane roll is rotate-direction agnostic).
    """
    assert 4 * HIDDEN_DIM == LANE
    H, I, C = HIDDEN_DIM, INPUT_DIM, NUM_CLASSES
    f64 = lambda a: np.asarray(a, np.float64)

    we_t = f64(p["we"]).T                                   # (I, H) (in, out)
    be = f64(p["be"])                                       # (H,)

    wvo, wrf = [], []
    for l in range(NUM_LAYERS):
        mv = f64(p["time_mix_v"][l])[:, None]
        mr = f64(p["time_mix_r"][l])[:, None]
        wvo.append((mv * f64(p["wv"][l]).T) @ f64(p["wo"][l]).T)  # (H, H)
        wrf.append(mr * f64(p["wr"][l]).T)                         # (H, H)

    P = np.zeros((TOTAL_ROWS, LANE), np.float64)

    # Fused embedding + layer-0 slab and its bias row: [u0 | h0 | rpre0 | h0]
    P[ROW_EMB:ROW_EMB + I, 0:H] = we_t @ wvo[0]
    P[ROW_EMB:ROW_EMB + I, H:2 * H] = we_t
    P[ROW_EMB:ROW_EMB + I, 2 * H:3 * H] = we_t @ wrf[0]
    P[ROW_EMB:ROW_EMB + I, 3 * H:4 * H] = we_t
    P[ROW_VEC + 0, 0:H] = be @ wvo[0]
    P[ROW_VEC + 0, H:2 * H] = be
    P[ROW_VEC + 0, 2 * H:3 * H] = be @ wrf[0]
    P[ROW_VEC + 0, 3 * H:4 * H] = be

    P[ROW_VEC + 1, 0:H] = f64(p["gamma"])
    P[ROW_VEC + 2, 0:H] = f64(p["beta"])
    P[ROW_VEC + 3, 0:C] = f64(p["bc"])
    P[ROW_VEC + 4, 0:H] = 1.0                               # lane mask

    # Layers >= 1: (128, 128) slabs, zero K-pad rows: [Wvo_l | 0 | Wr'_l | 0]
    for l in range(1, NUM_LAYERS):
        r0 = ROW_WL + (l - 1) * LANE
        P[r0:r0 + H, 0:H] = wvo[l]
        P[r0:r0 + H, 2 * H:3 * H] = wrf[l]

    # Classifier slab, zero-padded to 128 rows x 128 output lanes.
    P[ROW_WC:ROW_WC + H, 0:C] = f64(p["wc"]).T

    return jnp.asarray(P, dtype=jnp.float32)


def ref_forward(x, p):
    """Pure-JAX reference mirroring the PyTorch module (seq_len == 1, zero state)."""
    h = x @ p["we"].T + p["be"]
    for l in range(NUM_LAYERS):
        xt = h
        v = (xt * p["time_mix_v"][l]) @ p["wv"][l].T
        r = jax.nn.sigmoid((xt * p["time_mix_r"][l]) @ p["wr"][l].T)
        out = r * (v @ p["wo"][l].T)
        h2 = h + out
        mean = h2.mean(-1, keepdims=True)
        var = ((h2 - mean) ** 2).mean(-1, keepdims=True)
        h = (h2 - mean) / jnp.sqrt(var + LN_EPS) * p["gamma"] + p["beta"]
    return h @ p["wc"].T + p["bc"]


if __name__ == "__main__":
    key = jax.random.PRNGKey(0)
    pkey, xkey = jax.random.split(key)
    params = init_params(pkey)
    packed = pack_kernel_params(params)

    x = jax.random.normal(xkey, (BATCH, INPUT_DIM), jnp.float32)

    out = jax.block_until_ready(simple_rwkv_forward(x, packed))

    ref = ref_forward(x, params)
    np.testing.assert_allclose(np.asarray(out), np.asarray(ref),
                               rtol=1e-4, atol=1e-4)
    print("KERNEL_OK")
</pallas_src>

<mosaic_0001>
module attributes {stable_mosaic.version = 11 : i64} {
  func.func @simple_rwkv_kernel(%arg0: memref<4x16xf32, #tpu.memory_space<vmem>>, %arg1: memref<280x128xf32, #tpu.memory_space<vmem>>, %arg2: memref<4x128xf32, #tpu.memory_space<vmem>>) attributes {dimension_semantics = [], scalar_prefetch = 0 : i64, scratch_operands = 0 : i64, tpu.core_type = #tpu.core_type<tc>} {
    %c0 = arith.constant 0 : index
    %c0_0 = arith.constant 0 : index
    %0 = vector.load %arg0[%c0, %c0_0] : memref<4x16xf32, #tpu.memory_space<vmem>>, vector<4x16xf32>
    %c0_1 = arith.constant 0 : index
    %c0_2 = arith.constant 0 : index
    %1 = vector.load %arg1[%c0_1, %c0_2] : memref<280x128xf32, #tpu.memory_space<vmem>>, vector<16x128xf32>
    %c16 = arith.constant 16 : index
    %c0_3 = arith.constant 0 : index
    %2 = vector.load %arg1[%c16, %c0_3] : memref<280x128xf32, #tpu.memory_space<vmem>>, vector<1x128xf32>
    %c17 = arith.constant 17 : index
    %c0_4 = arith.constant 0 : index
    %3 = vector.load %arg1[%c17, %c0_4] : memref<280x128xf32, #tpu.memory_space<vmem>>, vector<1x128xf32>
    %c18 = arith.constant 18 : index
    %c0_5 = arith.constant 0 : index
    %4 = vector.load %arg1[%c18, %c0_5] : memref<280x128xf32, #tpu.memory_space<vmem>>, vector<1x128xf32>
    %c19 = arith.constant 19 : index
    %c0_6 = arith.constant 0 : index
    %5 = vector.load %arg1[%c19, %c0_6] : memref<280x128xf32, #tpu.memory_space<vmem>>, vector<1x128xf32>
    %c20 = arith.constant 20 : index
    %c0_7 = arith.constant 0 : index
    %6 = vector.load %arg1[%c20, %c0_7] : memref<280x128xf32, #tpu.memory_space<vmem>>, vector<1x128xf32>
    %7 = vector.shape_cast %3 : vector<1x128xf32> to vector<1x128xf32>
    %8 = vector.broadcast %7 : vector<1x128xf32> to vector<4x128xf32>
    %9 = vector.shape_cast %4 : vector<1x128xf32> to vector<1x128xf32>
    %10 = vector.broadcast %9 : vector<1x128xf32> to vector<4x128xf32>
    %11 = vector.shape_cast %6 : vector<1x128xf32> to vector<1x128xf32>
    %12 = vector.broadcast %11 : vector<1x128xf32> to vector<4x128xf32>
    %cst = arith.constant dense<0.000000e+00> : vector<4x128xf32>
    %13 = tpu.matmul %0, %1, %cst {dimension_numbers = #tpu.dot_dimension_numbers<[1], [0], [0], [1], [0, 0, 1, 1], [], []>} : vector<4x16xf32>, vector<16x128xf32>, vector<4x128xf32> -> vector<4x128xf32>
    %14 = vector.broadcast %2 : vector<1x128xf32> to vector<4x128xf32>
    %15 = arith.addf %13, %14 : vector<4x128xf32>
    %16 = arith.negf %15 : vector<4x128xf32>
    %17 = math.exp %16 : vector<4x128xf32>
    %cst_8 = arith.constant 1.000000e+00 : f32
    %18 = vector.broadcast %cst_8 : f32 to vector<4x128xf32>
    %19 = arith.addf %18, %17 : vector<4x128xf32>
    %20 = arith.divf %18, %19 : vector<4x128xf32>
    %c64_i32 = arith.constant 64 : i32
    %21 = tpu.dynamic_rotate %20 by %c64_i32 dim 1 : vector<4x128xf32>, i32 -> vector<4x128xf32>
    %c32_i32 = arith.constant 32 : i32
    %22 = tpu.dynamic_rotate %15 by %c32_i32 dim 1 : vector<4x128xf32>, i32 -> vector<4x128xf32>
    %23 = arith.mulf %21, %15 : vector<4x128xf32>
    %24 = arith.addf %22, %23 : vector<4x128xf32>
    %25 = arith.mulf %24, %12 : vector<4x128xf32>
    %cst_9 = arith.constant dense<0.000000e+00> : vector<4xf32>
    %26 = vector.multi_reduction <add>, %25, %cst_9 [1] : vector<4x128xf32> to vector<4xf32>
    %27 = vector.shape_cast %26 : vector<4xf32> to vector<4x1xf32>
    %28 = arith.mulf %25, %25 : vector<4x128xf32>
    %cst_10 = arith.constant dense<0.000000e+00> : vector<4xf32>
    %29 = vector.multi_reduction <add>, %28, %cst_10 [1] : vector<4x128xf32> to vector<4xf32>
    %30 = vector.shape_cast %29 : vector<4xf32> to vector<4x1xf32>
    %cst_11 = arith.constant 3.125000e-02 : f32
    %31 = vector.broadcast %cst_11 : f32 to vector<4x1xf32>
    %32 = arith.mulf %27, %31 : vector<4x1xf32>
    %cst_12 = arith.constant 3.125000e-02 : f32
    %33 = vector.broadcast %cst_12 : f32 to vector<4x1xf32>
    %34 = arith.mulf %30, %33 : vector<4x1xf32>
    %35 = arith.mulf %32, %32 : vector<4x1xf32>
    %36 = arith.subf %34, %35 : vector<4x1xf32>
    %37 = vector.broadcast %32 : vector<4x1xf32> to vector<4x128xf32>
    %38 = arith.subf %25, %37 : vector<4x128xf32>
    %cst_13 = arith.constant 9.99999974E-6 : f32
    %39 = vector.broadcast %cst_13 : f32 to vector<4x1xf32>
    %40 = arith.addf %36, %39 : vector<4x1xf32>
    %41 = math.rsqrt %40 : vector<4x1xf32>
    %42 = vector.broadcast %41 : vector<4x1xf32> to vector<4x128xf32>
    %43 = arith.mulf %38, %42 : vector<4x128xf32>
    %44 = arith.mulf %43, %8 : vector<4x128xf32>
    %45 = arith.addf %44, %10 : vector<4x128xf32>
    %c24 = arith.constant 24 : index
    %c0_14 = arith.constant 0 : index
    %46 = vector.load %arg1[%c24, %c0_14] : memref<280x128xf32, #tpu.memory_space<vmem>>, vector<128x128xf32>
    %cst_15 = arith.constant dense<0.000000e+00> : vector<4x128xf32>
    %47 = tpu.matmul %45, %46, %cst_15 {dimension_numbers = #tpu.dot_dimension_numbers<[1], [0], [0], [1], [0, 0, 1, 1], [], []>} : vector<4x128xf32>, vector<128x128xf32>, vector<4x128xf32> -> vector<4x128xf32>
    %48 = arith.negf %47 : vector<4x128xf32>
    %49 = math.exp %48 : vector<4x128xf32>
    %cst_16 = arith.constant 1.000000e+00 : f32
    %50 = vector.broadcast %cst_16 : f32 to vector<4x128xf32>
    %51 = arith.addf %50, %49 : vector<4x128xf32>
    %52 = arith.divf %50, %51 : vector<4x128xf32>
    %c64_i32_17 = arith.constant 64 : i32
    %53 = tpu.dynamic_rotate %52 by %c64_i32_17 dim 1 : vector<4x128xf32>, i32 -> vector<4x128xf32>
    %54 = arith.mulf %53, %47 : vector<4x128xf32>
    %55 = arith.addf %45, %54 : vector<4x128xf32>
    %56 = arith.mulf %55, %12 : vector<4x128xf32>
    %cst_18 = arith.constant dense<0.000000e+00> : vector<4xf32>
    %57 = vector.multi_reduction <add>, %56, %cst_18 [1] : vector<4x128xf32> to vector<4xf32>
    %58 = vector.shape_cast %57 : vector<4xf32> to vector<4x1xf32>
    %59 = arith.mulf %56, %56 : vector<4x128xf32>
    %cst_19 = arith.constant dense<0.000000e+00> : vector<4xf32>
    %60 = vector.multi_reduction <add>, %59, %cst_19 [1] : vector<4x128xf32> to vector<4xf32>
    %61 = vector.shape_cast %60 : vector<4xf32> to vector<4x1xf32>
    %cst_20 = arith.constant 3.125000e-02 : f32
    %62 = vector.broadcast %cst_20 : f32 to vector<4x1xf32>
    %63 = arith.mulf %58, %62 : vector<4x1xf32>
    %cst_21 = arith.constant 3.125000e-02 : f32
    %64 = vector.broadcast %cst_21 : f32 to vector<4x1xf32>
    %65 = arith.mulf %61, %64 : vector<4x1xf32>
    %66 = arith.mulf %63, %63 : vector<4x1xf32>
    %67 = arith.subf %65, %66 : vector<4x1xf32>
    %68 = vector.broadcast %63 : vector<4x1xf32> to vector<4x128xf32>
    %69 = arith.subf %56, %68 : vector<4x128xf32>
    %cst_22 = arith.constant 9.99999974E-6 : f32
    %70 = vector.broadcast %cst_22 : f32 to vector<4x1xf32>
    %71 = arith.addf %67, %70 : vector<4x1xf32>
    %72 = math.rsqrt %71 : vector<4x1xf32>
    %73 = vector.broadcast %72 : vector<4x1xf32> to vector<4x128xf32>
    %74 = arith.mulf %69, %73 : vector<4x128xf32>
    %75 = arith.mulf %74, %8 : vector<4x128xf32>
    %76 = arith.addf %75, %10 : vector<4x128xf32>
    %c152 = arith.constant 152 : index
    %c0_23 = arith.constant 0 : index
    %77 = vector.load %arg1[%c152, %c0_23] : memref<280x128xf32, #tpu.memory_space<vmem>>, vector<128x128xf32>
    %cst_24 = arith.constant dense<0.000000e+00> : vector<4x128xf32>
    %78 = tpu.matmul %76, %77, %cst_24 {dimension_numbers = #tpu.dot_dimension_numbers<[1], [0], [0], [1], [0, 0, 1, 1], [], []>} : vector<4x128xf32>, vector<128x128xf32>, vector<4x128xf32> -> vector<4x128xf32>
    %79 = vector.broadcast %5 : vector<1x128xf32> to vector<4x128xf32>
    %80 = arith.addf %78, %79 : vector<4x128xf32>
    %c0_25 = arith.constant 0 : index
    %c0_26 = arith.constant 0 : index
    %81 = vector.load %arg2[%c0_25, %c0_26] : memref<4x128xf32, #tpu.memory_space<vmem>>, vector<4x128xf32>
    tpu.vector_store %arg2[%c0_25, %c0_26], %80 {strides = array<i32>} : memref<4x128xf32, #tpu.memory_space<vmem>>, vector<4x128xf32>,
    return
  }
}

</mosaic_0001>

<bundles_post_ra>
// kernel: simple_rwkv_forward.1
= control target key start
LH: loop header
LB: loop body
LE: loop exit
PB: predicated region body
PF: predicated region fallthrough
CT: control target
= control target key end

     0   :  { %7 = vsyncpa [#allocation3], 0  ;;  %s758_s0 = inlined_call_operand.hbm [shape: f32[4,16], index: 0, kind: input, shape index: {}]   ;;  %s759_s1 = inlined_call_operand.hbm [shape: f32[280,128], index: 1, kind: input, shape index: {}]   ;;  %s760_s2 = inlined_call_operand.hbm [shape: f32[4,128], index: 2, kind: output, shape index: {}]  }
   0x1   :  { %8 = vsyncpa [#allocation6], 0 }
   0x2   :  { %9 = vsyncpa [#allocation4], 0  ;;  %s655_s9 = smov [#allocation2]   ;;  %s656_s11 = smov [#allocation5]  }
   0x3   :  { %s16_s10 = sshll.u32 %s655_s9, 4  ;;  %s25_s12 = sshll.u32 %s656_s11, 4  ;;  %s17_s10 = int_to_ptr.vmem [resolvable:$true] %s16_s10  ;;  %s680_s12 = int_to_ptr.vmem [resolvable:$true] %s25_s12 }
   0x4   :  { %s583_s15 = scalar_lea.hbm %s758_s0, 64 }
   0x5   :  { %p584_p0 = scmp.ne.s32.totalorder %s758_s0, %s583_s15  ;;  %p587_p1 = scmp.lt.u32.totalorder %s583_s15, %s758_s0 }
   0x7   :  { %p589_p2 = pnand %p587_p1, %p584_p0 }
   0x9   :  { %592 = shalt.err (!%p589_p2)
}
   0xa   :  { %s593_s20 = scalar_lea.vmem %s17_s10, 64  ;;  %p598_p4 = scmp.lt.s32.totalorder %s17_s10, %s17_s10 }
   0xb   :  { %p594_p3 = scmp.ne.s32.totalorder %s17_s10, %s593_s20  ;;  %p599_p5 = scmp.lt.s32.totalorder %s593_s20, %s593_s20 }
   0xd   :  { %p600_p6 = por %p599_p5, %p598_p4 }
   0xf   :  { %p601_p7 = pnand %p600_p6, %p594_p3 }
  0x11   :  { %604 = shalt.err (!%p601_p7)
}
  0x12   :  { %19 = dma.hbm_to_vmem [thread:$0]  %s758_s0, 64, %s17_s10, [#allocation3]  }
  0x13   :  { %s605_s25 = scalar_lea.hbm %s759_s1, 4480 }
  0x14   :  { %p606_p8 = scmp.ne.s32.totalorder %s759_s1, %s605_s25  ;;  %p609_p9 = scmp.lt.u32.totalorder %s605_s25, %s759_s1 }
  0x16   :  { %p611_p10 = pnand %p609_p9, %p606_p8 }
  0x18   :  { %614 = shalt.err (!%p611_p10)
}
  0x19   :  { %s615_s30 = scalar_lea.vmem %s680_s12, 4480  ;;  %p620_p12 = scmp.lt.s32.totalorder %s680_s12, %s680_s12 }
  0x1a   :  { %p616_p11 = scmp.ne.s32.totalorder %s680_s12, %s615_s30  ;;  %p621_p13 = scmp.lt.s32.totalorder %s615_s30, %s615_s30 }
  0x1c   :  { %p622_p0 = por %p621_p13, %p620_p12 }
  0x1e   :  { %p623_p1 = pnand %p622_p0, %p616_p11 }
  0x20   :  { %626 = shalt.err (!%p623_p1)
}
  0x21   :  { %s657_s0 = smov 128   ;;  %s658_s3 = smov 8  }
  0x22   :  { %31 = dma.hbm_to_vmem [thread:$0]  %s759_s1, 4480, %s680_s12, [#allocation6], %s657_s0, %s657_s0, %s658_s3  }
  0x23   :  { %649 = dma.done.wait [#allocation3], 64  }
  0x24   :  { %650 = vsyncadd [#allocation3], 4294967232 }
  0x25   :  { %651 = dma.done.wait [#allocation6], 4480  }
  0x26   :  { %652 = vsyncadd [#allocation6], 4294962816  ;;  %v659_v0 = vmov 0.0|0.0   ;;  %vm660_vm0 = vmmov 0   ;;  %v661_v1 = vmov 0.0   ;;  %v39_v2 = vld [vmem:[#allocation5] sm:$0xff] }
  0x27   :  { %510 = vmatprep.subr.bf16.mxu0 %v659_v0  ;;  %437 = vmatprep.mubr.msk.f32.mxu0 %vm660_vm0, %v661_v1  ;;  %v40_v3 = vld [vmem:[#allocation5 + $0x8] sm:$0xff]  ;;  %v38_v5 = vld [vmem:[#allocation2] sm:$0xf]  ;;  %vm62_vm1 = vcmask 130048   ;;  %v391_v6 = vld [vmem:[#allocation5 + $0x10] ss:$0 sm:$0xff] }
  0x28   :  { %513 = vmatprep.subr.bf16.mxu1 %v659_v0  ;;  %472 = vmatprep.mubr.msk.f32.mxu1 %vm660_vm0, %v661_v1  ;;  %v511_v4 = vpack.c.bf16 %v40_v3, %v39_v2  ;;  %s662_s1 = smov 64   ;;  %v167_v14 = vld [vmem:[#allocation5 + $0x18] sm:$0xff]  ;;  %v168_v15 = vld [vmem:[#allocation5 + $0x20] sm:$0xff]  ;;  %s663_s6 = smov 32   ;;  %v716_v19 = vld [vmem:[#allocation5 + $0x14] ss:$0 sm:$0xff] }
  0x29   :  { %v514_v16 = vpack.c.bf16 %v168_v15, %v167_v14  ;;  %vm149_vm2 = vcmask 1043456   ;;  %v169_v26 = vld [vmem:[#allocation5 + $0x28] sm:$0xff]  ;;  %v170_v27 = vld [vmem:[#allocation5 + $0x30] sm:$0xff]  ;;  %v171_v29 = vld [vmem:[#allocation5 + $0x38] sm:$0xff]  ;;  %s664_s7 = smov [#allocation7]  }
  0x2a   :  { %512 = vmatpush3.bf16.msra.mxu0 %v511_v4  ;;  %v517_v28 = vpack.c.bf16 %v170_v27, %v169_v26  ;;  %v172_v30 = vld [vmem:[#allocation5 + $0x40] sm:$0xff]  ;;  %v173_v32 = vld [vmem:[#allocation5 + $0x48] sm:$0xff]  ;;  %v174_v33 = vld [vmem:[#allocation5 + $0x50] sm:$0xff]  ;;  %s378_s8 = sshll.u32 %s664_s7, 4  ;;  %s379_s8 = int_to_ptr.vmem [resolvable:$true] %s378_s8 }
  0x2b   :  { %537 = vmatprep.subr.bf16.mxu0 %v659_v0  ;;  %515 = vmatpush3.bf16.msra.mxu1 %v514_v16  ;;  %v520_v31 = vpack.c.bf16 %v172_v30, %v171_v29  ;;  %v523_v34 = vpack.c.bf16 %v174_v33, %v173_v32  ;;  %v175_v35 = vld [vmem:[#allocation5 + $0x58] sm:$0xff]  ;;  %v176_v36 = vld [vmem:[#allocation5 + $0x60] sm:$0xff]  ;;  %v177_v38 = vld [vmem:[#allocation5 + $0x68] sm:$0xff]  ;;  %s627_s9 = scalar_lea.vmem %s379_s8, 64  ;;  %p632_p3 = scmp.lt.s32.totalorder %s379_s8, %s379_s8 }
  0x2c   :  { %516 = vmatprep.subr.bf16.mxu1 %v659_v0  ;;  %v526_v37 = vpack.c.bf16 %v176_v36, %v175_v35  ;;  %v178_v39 = vld [vmem:[#allocation5 + $0x70] sm:$0xff]  ;;  %v179_v41 = vld [vmem:[#allocation5 + $0x78] sm:$0xff]  ;;  %v180_v42 = vld [vmem:[#allocation5 + $0x80] sm:$0xff]  ;;  %p628_p2 = scmp.ne.s32.totalorder %s379_s8, %s627_s9  ;;  %p633_p4 = scmp.lt.s32.totalorder %s627_s9, %s627_s9 }
  0x2d   :  { %438 = vmatmul.mubr.msk.f32.vlgmr.msra.gmra.mrb[0].mxu0 %vm62_vm1, %v38_v5  ;;  %v529_v40 = vpack.c.bf16 %v178_v39, %v177_v38  ;;  %v532_v43 = vpack.c.bf16 %v180_v42, %v179_v41  ;;  %v181_v44 = vld [vmem:[#allocation5 + $0x88] sm:$0xff]  ;;  %v182_v45 = vld [vmem:[#allocation5 + $0x90] sm:$0xff]  ;;  %v281_v3 = vld [vmem:[#allocation5 + $0x98] sm:$0xff] }
  0x2e   :  { %507 = vmatprep.mubr.msk.f32.mxu0 %vm660_vm0, %v661_v1  ;;  %v535_v46 = vpack.c.bf16 %v182_v45, %v181_v44  ;;  %v727_v56 = vld [vmem:[#allocation5 + $0x11] ss:$0 sm:$0xff]  ;;  %v729_v58 = vld [vmem:[#allocation5 + $0x12] ss:$0 sm:$0xff]  ;;  %v282_v4 = vld [vmem:[#allocation5 + $0xa0] sm:$0xff]  ;;  %p634_p5 = por %p633_p4, %p632_p3 }
  0x2f   :  { %518 = vmatpush3.bf16.msra.mxu1 %v517_v28  ;;  %v283_v5 = vld [vmem:[#allocation5 + $0xa8] sm:$0xff]  ;;  %v292_v27 = vld [vmem:[#allocation5 + $0xf0] sm:$0xff]  ;;  %v293_v29 = vld [vmem:[#allocation5 + $0xf8] sm:$0xff] }
  0x30   :  { %519 = vmatprep.subr.bf16.mxu1 %v659_v0  ;;  %v291_v26 = vld [vmem:[#allocation5 + $0xe8] sm:$0xff]  ;;  %v294_v30 = vld [vmem:[#allocation5 + $0x100] sm:$0xff]  ;;  %v296_v33 = vld [vmem:[#allocation5 + $0x110] sm:$0xff]  ;;  %p635_p6 = pnand %p634_p5, %p628_p2 }
  0x31   :  { %v553_v28 = vpack.c.bf16 %v292_v27, %v291_v26  ;;  %v295_v32 = vld [vmem:[#allocation5 + $0x108] sm:$0xff] }
  0x33   :  { %521 = vmatpush3.bf16.msra.mxu1 %v520_v31  ;;  %v556_v31 = vpack.c.bf16 %v294_v30, %v293_v29 }
  0x34   :  { %522 = vmatprep.subr.bf16.mxu1 %v659_v0 }
  0x37   :  { %524 = vmatpush3.bf16.msra.mxu1 %v523_v34  ;;  %v559_v34 = vpack.c.bf16 %v296_v33, %v295_v32 }
  0x38   :  { %525 = vmatprep.subr.bf16.mxu1 %v659_v0 }
  0x3b   :  { %527 = vmatpush3.bf16.msra.mxu1 %v526_v37 }
  0x3c   :  { %528 = vmatprep.subr.bf16.mxu1 %v659_v0 }
  0x3f   :  { %530 = vmatpush3.bf16.msra.mxu1 %v529_v40 }
  0x40   :  { %531 = vmatprep.subr.bf16.mxu1 %v659_v0 }
  0x43   :  { %533 = vmatpush3.bf16.msra.mxu1 %v532_v43 }
  0x44   :  { %534 = vmatprep.subr.bf16.mxu1 %v659_v0 }
  0x47   :  { %536 = vmatpush3.bf16.msra.mxu1 %v535_v46 }
 0x100   :  { %v132_v7 = vpop.f32.mrb[0].mxu0 }
 0x101   :  { %v133_v8 = vadd.f32 %v391_v6, %v132_v7  ;;  %v439_v9 = vpop.f32.mrb[1].mxu0  ;;  %v538_v6 = vpack.c.bf16 %v282_v4, %v281_v3  ;;  %v284_v7 = vld [vmem:[#allocation5 + $0xb0] sm:$0xff] }
 0x102   :  { %v541_v9 = vpack.c.bf16 %v284_v7, %v283_v5 }
 0x103   :  { %v393_v10 = vmul.f32 -1.442695, %v133_v8  ;;  %539 = vmatpush3.bf16.msra.mxu0 %v538_v6 }
 0x104   :  { %540 = vmatprep.subr.bf16.mxu0 %v659_v0 }
 0x105   :  { %571 = vpow2.f32 %v393_v10 }
 0x107   :  { %542 = vmatpush3.bf16.msra.mxu0 %v541_v9 }
 0x108   :  { %543 = vmatprep.subr.bf16.mxu0 %v659_v0 }
 0x10f   :  { %v572_v11 = vpop.eup %571 }
 0x110   :  { %v139_v12 = vadd.f32 1.0, %v572_v11 }
 0x112   :  { %573 = vrcp.f32 %v139_v12 }
 0x11c   :  { %v574_v13 = vpop.eup %573 }
 0x11d   :  { %142 = vrot.lane.b32.xlu0 %v574_v13, %s662_s1 }
 0x121   :  { %144 = vrot.lane.b32.xlu0 %v133_v8, %s663_s6 }
 0x18f   :  { %v143_v17 = vpop.permute.xlu0 %142 }
 0x190   :  { %v146_v18 = vmul.f32 %v143_v17, %v133_v8  ;;  %v285_v17 = vld [vmem:[#allocation5 + $0xb8] sm:$0xff] }
 0x193   :  { %v145_v20 = vpop.permute.xlu0 %144 }
 0x194   :  { %v147_v21 = vadd.f32 %v146_v18, %v145_v20  ;;  %v286_v18 = vld [vmem:[#allocation5 + $0xc0] sm:$0xff] }
 0x195   :  { %v544_v20 = vpack.c.bf16 %v286_v18, %v285_v17 }
 0x196   :  { %v148_v22 = vmul.f32 %v716_v19, %v147_v21  ;;  %v287_v21 = vld [vmem:[#allocation5 + $0xc8] sm:$0xff] }
 0x197   :  { %545 = vmatpush3.bf16.msra.mxu0 %v544_v20 }
 0x198   :  { %v150_v23 = vsel %vm149_vm2, %v148_v22, 0.0  ;;  %v153_v24 = vmul.f32 %v148_v22, %v148_v22  ;;  %546 = vmatprep.subr.bf16.mxu0 %v659_v0 }
 0x199   :  { %151 = vadd.xlane.f32.xlu1 %v150_v23 }
 0x19a   :  { %v154_v25 = vsel %vm149_vm2, %v153_v24, 0.0  ;;  %v290_v24 = vld [vmem:[#allocation5 + $0xe0] sm:$0xff] }
 0x19d   :  { %155 = vadd.xlane.f32.xlu1 %v154_v25 }
 0x226   :  { %v152_v47 = vpop.xlane.xlu1 %151 }
 0x227   :  { %v157_v48 = vmul.f32 0.03125, %v152_v47  ;;  %v395_v47 = vld [vmem:[#allocation5 + $0x13] ss:$0 sm:$0xff] }
 0x229   :  { %v159_v50 = vmul.f32 %v157_v48, %v157_v48  ;;  %v161_v54 = vsub.f32 %v148_v22, %v157_v48  ;;  %v288_v22 = vld [vmem:[#allocation5 + $0xd0] sm:$0xff] }
 0x22a   :  { %v156_v49 = vpop.xlane.xlu1 %155  ;;  %v547_v23 = vpack.c.bf16 %v288_v22, %v287_v21 }
 0x22b   :  { %v158_v51 = vmul.f32 0.03125, %v156_v49 }
 0x22c   :  { %548 = vmatpush3.bf16.msra.mxu0 %v547_v23 }
 0x22d   :  { %v160_v52 = vsub.f32 %v158_v51, %v159_v50  ;;  %549 = vmatprep.subr.bf16.mxu0 %v659_v0 }
 0x22f   :  { %v162_v53 = vadd.f32 1e-05, %v160_v52 }
 0x231   :  { %575 = vrsqrt.f32 %v162_v53 }
 0x23b   :  { %v576_v55 = vpop.eup %575 }
 0x23c   :  { %v164_v57 = vmul.f32 %v576_v55, %v161_v54 }
 0x23e   :  { %v165_v59 = vmul.f32 %v727_v56, %v164_v57 }
 0x240   :  { %v166_v60 = vadd.f32 %v729_v58, %v165_v59 }
 0x242   :  { %473 = vmatmul.mubr.f32.vlgmr.msra.gmra.mrb[0].mxu1 %v166_v60 }
 0x315   :  { %v249_v61 = vpop.f32.mrb[0].mxu1 }
 0x316   :  { %v394_v62 = vmul.f32 -1.442695, %v249_v61  ;;  %v474_v63 = vpop.f32.mrb[1].mxu1 }
 0x318   :  { %577 = vpow2.f32 %v394_v62 }
 0x322   :  { %v578_v1 = vpop.eup %577 }
 0x323   :  { %v256_v2 = vadd.f32 1.0, %v578_v1 }
 0x325   :  { %579 = vrcp.f32 %v256_v2 }
 0x32f   :  { %v580_v8 = vpop.eup %579 }
 0x330   :  { %259 = vrot.lane.b32.xlu0 %v580_v8, %s662_s1 }
 0x3a2   :  { %v260_v10 = vpop.permute.xlu0 %259 }
 0x3a3   :  { %v261_v11 = vmul.f32 %v260_v10, %v249_v61 }
 0x3a5   :  { %v262_v12 = vadd.f32 %v261_v11, %v166_v60 }
 0x3a7   :  { %v263_v13 = vmul.f32 %v716_v19, %v262_v12  ;;  %v289_v19 = vld [vmem:[#allocation5 + $0xd8] sm:$0xff] }
 0x3a8   :  { %v550_v25 = vpack.c.bf16 %v290_v24, %v289_v19 }
 0x3a9   :  { %v264_v14 = vsel %vm149_vm2, %v263_v13, 0.0  ;;  %v267_v15 = vmul.f32 %v263_v13, %v263_v13 }
 0x3aa   :  { %265 = vadd.xlane.f32.xlu1 %v264_v14  ;;  %551 = vmatpush3.bf16.msra.mxu0 %v550_v25 }
 0x3ab   :  { %v268_v16 = vsel %vm149_vm2, %v267_v15, 0.0  ;;  %552 = vmatprep.subr.bf16.mxu0 %v659_v0 }
 0x3ac   :  { %269 = vadd.xlane.f32.xlu0 %v268_v16 }
 0x3ae   :  { %554 = vmatpush3.bf16.msra.mxu0 %v553_v28 }
 0x3af   :  { %555 = vmatprep.subr.bf16.mxu0 %v659_v0 }
 0x3b2   :  { %557 = vmatpush3.bf16.msra.mxu0 %v556_v31 }
 0x3b3   :  { %558 = vmatprep.subr.bf16.mxu0 %v659_v0 }
 0x3b6   :  { %560 = vmatpush3.bf16.msra.mxu0 %v559_v34 }
 0x437   :  { %v266_v35 = vpop.xlane.xlu1 %265 }
 0x438   :  { %v271_v36 = vmul.f32 0.03125, %v266_v35 }
 0x439   :  { %v270_v37 = vpop.xlane.xlu0 %269 }
 0x43a   :  { %v273_v38 = vmul.f32 %v271_v36, %v271_v36  ;;  %v272_v39 = vmul.f32 0.03125, %v270_v37  ;;  %v275_v42 = vsub.f32 %v263_v13, %v271_v36 }
 0x43c   :  { %v274_v40 = vsub.f32 %v272_v39, %v273_v38 }
 0x43e   :  { %v276_v41 = vadd.f32 1e-05, %v274_v40 }
 0x440   :  { %581 = vrsqrt.f32 %v276_v41 }
 0x44a   :  { %v582_v43 = vpop.eup %581 }
 0x44b   :  { %v278_v44 = vmul.f32 %v582_v43, %v275_v42 }
 0x44d   :  { %v279_v45 = vmul.f32 %v727_v56, %v278_v44 }
 0x44f   :  { %v280_v46 = vadd.f32 %v729_v58, %v279_v45 }
 0x451   :  { %508 = vmatmul.mubr.f32.vlgmr.msra.gmra.mrb[2].mxu0 %v280_v46 }
 0x524   :  { %v367_v0 = vpop.f32.mrb[2].mxu0 }
 0x525   :  { %v368_v48 = vadd.f32 %v395_v47, %v367_v0  ;;  %v509_v49 = vpop.f32.mrb[3].mxu0 }
 0x527   :  { %371 = vst [vmem:[#allocation7] sm:$0xf] %v368_v48 }
 0x528   :  { %638 = shalt.err (!%p635_p6)
}
 0x529   :  { %s639_s12 = scalar_lea.hbm %s760_s2, 64 }
 0x52a   :  { %p640_p7 = scmp.ne.s32.totalorder %s760_s2, %s639_s12  ;;  %p643_p8 = scmp.lt.u32.totalorder %s639_s12, %s760_s2 }
 0x52c   :  { %p645_p9 = pnand %p643_p8, %p640_p7 }
 0x52e   :  { %648 = shalt.err (!%p645_p9)
}
 0x52f   :  { %381 = dma.vmem_to_hbm [thread:$0]  %s379_s8, 64, %s760_s2, [#allocation4]  }
 0x530   :  { %653 = dma.done.wait [#allocation4], 64  }
 0x531   :  { %654 = vsyncadd [#allocation4], 4294967232 }
 0x532   :  { %385 = vsyncpa [#allocation3], 1 }
 0x533   :  { %386 = vsyncpa [#allocation6], 1 }
 0x534   :  { %387 = vsyncpa [#allocation4], 1 }

</bundles_post_ra>
